<compile_context>
chip_gen: v7x
topology: tpu7x:2x2x1
jax: 0.10.0
libtpu: 0.0.40
codegen_flags: <defaults>
</compile_context>

<pallas_src>
import functools

import jax
import jax.numpy as jnp
from jax import lax
from jax.experimental import pallas as pl
from jax.experimental.pallas import tpu as pltpu


DROP_P = 0.4              # F.dropout(x, 0.4): default training=True -> active dropout
KEEP_P = 1.0 - DROP_P
_NEG_BIG = -1e30          # pad value for class-logit bias (vanishes in log_softmax)


def _signed32(x):
    """uint32 literal -> equivalent signed int32 Python int (two's complement)."""
    x &= 0xFFFFFFFF
    return x - (1 << 32) if x >= (1 << 31) else x


# Hash constants as *Python ints* (weak-typed literals -> never captured consts).
_C1 = _signed32(0x9E3779B1)
_C2 = _signed32(0x85EBCA77)
_C3 = _signed32(0xC2B2AE3D)
_C4 = _signed32(0x85EBCA6B)
_C5 = _signed32(0xC2B2AE35)
# keep iff (hash & 0x7FFFFF) < threshold  (23-bit nonnegative compare)
_KEEP_THR_23 = int(round(KEEP_P * (1 << 23)))


def _round_up(a, b):
    return ((a + b - 1) // b) * b


def _srl(z, s):
    """Logical right shift of an int32 array by a static amount."""
    return (z >> s) & ((1 << (32 - s)) - 1)


def _fc_kernel(seed_ref, x_ref, w1_ref, b1_ref, w2_ref, b2_ref, o_ref, *,
               apply_dropout):
    # ---- fc1: cast x to bf16 in-kernel, (Tn,D)bf16 @ (D,Hp)bf16 -> f32, +bias ----
    x = x_ref[...].astype(jnp.bfloat16)
    h = jnp.dot(x, w1_ref[...], preferred_element_type=jnp.float32)
    h = h + b1_ref[...]

    # ---- dropout(p=0.4), training semantics ----
    if apply_dropout:
        # Counter-based int32 hash keyed on (seed, global_row, col): pure VPU
        # integer ops, 2 mixing rounds, independent mask per grid tile.
        rows = lax.broadcasted_iota(jnp.int32, h.shape, 0)
        rows = rows + pl.program_id(0) * h.shape[0]
        cols = lax.broadcasted_iota(jnp.int32, h.shape, 1)
        z = rows * _C1 + cols * _C2 + seed_ref[0] * _C3
        z = (z ^ _srl(z, 16)) * _C4
        z = (z ^ _srl(z, 13)) * _C5
        z = z ^ _srl(z, 16)
        keep = (z & 0x7FFFFF) < _KEEP_THR_23
        h = jnp.where(keep, h * (1.0 / KEEP_P), 0.0)

    # ---- ReLU ----
    h = jnp.maximum(h, 0.0)

    # ---- fc2 on bf16 operands: (Tn,Hp)bf16 @ (Hp,Cp)bf16 -> f32, +bias ----
    logits = jnp.dot(h.astype(jnp.bfloat16), w2_ref[...],
                     preferred_element_type=jnp.float32)
    logits = logits + b2_ref[...]          # padded classes get -1e30 bias

    # ---- log_softmax over classes ----
    m = jnp.max(logits, axis=1, keepdims=True)
    s = logits - m
    lse = jnp.log(jnp.sum(jnp.exp(s), axis=1, keepdims=True))
    o_ref[...] = s - lse


@functools.partial(jax.jit, static_argnames=("training",))
def fc_forward(x, w1_t, b1, w2_t, b2, seed, training=True):
    """x: (N, d0, d1) float32; returns (N, num_classes) float32 log-probs."""
    n = x.shape[0]
    x2d = x.reshape(n, -1)                       # torch.flatten(x, start_dim=1)
    d = x2d.shape[1]
    h_real = w1_t.shape[1]
    c_real = w2_t.shape[1]

    # --- lane-dense padding of hidden / class dims (multiples of 128) ---
    h_pad = max(128, _round_up(h_real, 128))
    c_pad = max(128, _round_up(c_real, 128))
    w1p = (jnp.zeros((d, h_pad), jnp.float32)
           .at[:, :h_real].set(w1_t)).astype(jnp.bfloat16)
    b1p = jnp.zeros((1, h_pad), jnp.float32).at[:, :h_real].set(b1.reshape(1, -1))
    w2p = (jnp.zeros((h_pad, c_pad), jnp.float32)
           .at[:h_real, :c_real].set(w2_t)).astype(jnp.bfloat16)
    b2p = (jnp.full((1, c_pad), _NEG_BIG, jnp.float32)
           .at[:, :c_real].set(b2.reshape(1, -1)))

    # --- batch tiling: x streams as f32 (no wrapper copy), weights stay resident.
    # VMEM cap ~4 MB per x tile; prefer >=2 grid steps for megacore on v7x.
    tile_cap = max(8, min(2048, (4 * 1024 * 1024) // (4 * d)))
    if n < 16:
        tile_n = n                               # block == full array dim (legal)
    else:
        tile_n = _round_up(min(tile_cap, pl.cdiv(n, 2)), 8)
    grid = (pl.cdiv(n, tile_n),)                 # ragged tail block is masked

    kernel = functools.partial(_fc_kernel, apply_dropout=training)

    out = pl.pallas_call(
        kernel,
        out_shape=jax.ShapeDtypeStruct((n, c_pad), jnp.float32),
        grid_spec=pltpu.PrefetchScalarGridSpec(
            num_scalar_prefetch=1,                      # seed -> SMEM
            grid=grid,
            in_specs=[
                pl.BlockSpec((tile_n, d), lambda i, s: (i, 0)),      # x streams (f32)
                pl.BlockSpec((d, h_pad), lambda i, s: (0, 0)),       # w1 resident (bf16)
                pl.BlockSpec((1, h_pad), lambda i, s: (0, 0)),       # b1 resident
                pl.BlockSpec((h_pad, c_pad), lambda i, s: (0, 0)),   # w2 resident (bf16)
                pl.BlockSpec((1, c_pad), lambda i, s: (0, 0)),       # b2 resident
            ],
            out_specs=pl.BlockSpec((tile_n, c_pad), lambda i, s: (i, 0)),
        ),
        compiler_params=pltpu.CompilerParams(
            dimension_semantics=("parallel",),          # shards across TCs on v7x
            vmem_limit_bytes=32 * 1024 * 1024,          # safe on v5e/v6e/v7x
        ),
    )(seed, x2d, w1p, b1p, w2p, b2p)

    return out[:, :c_real]


def init_params(key, input_dim, hidden_n=50, num_classes=10):
    """Deterministic init matching nn.Linear's U(-1/sqrt(fan_in), 1/sqrt(fan_in))."""
    d = input_dim[0] * input_dim[1]
    k1, k2, k3, k4 = jax.random.split(key, 4)
    bound1 = 1.0 / jnp.sqrt(d)
    bound2 = 1.0 / jnp.sqrt(hidden_n)
    # stored transposed so the kernel computes x @ W + b
    w1_t = jax.random.uniform(k1, (d, hidden_n), jnp.float32, -bound1, bound1)
    b1 = jax.random.uniform(k2, (1, hidden_n), jnp.float32, -bound1, bound1)
    w2_t = jax.random.uniform(k3, (hidden_n, num_classes), jnp.float32, -bound2, bound2)
    b2 = jax.random.uniform(k4, (1, num_classes), jnp.float32, -bound2, bound2)
    return w1_t, b1, w2_t, b2


if __name__ == "__main__":
    key = jax.random.PRNGKey(0)
    kx, kp = jax.random.split(key)

    batch = 2
    input_dim = (16, 16)    # image-signature dims -> 256 flattened features
    hidden_n = 50
    num_classes = 10

    x = jax.random.normal(kx, (batch, input_dim[0], input_dim[1]), jnp.float32)
    w1_t, b1, w2_t, b2 = init_params(kp, input_dim, hidden_n, num_classes)
    seed = jnp.array([0], dtype=jnp.int32)

    # spec semantics: dropout active (F.dropout default training=True)
    out = fc_forward(x, w1_t, b1, w2_t, b2, seed, training=True)
    out = jax.block_until_ready(out)
    assert out.shape == (batch, num_classes)
    assert jnp.allclose(jnp.sum(jnp.exp(out), axis=1), 1.0, atol=1e-4)

    # eval-mode path (dropout bypassed) cross-checked against a plain-JAX ref
    out_eval = fc_forward(x, w1_t, b1, w2_t, b2, seed, training=False)
    out_eval = jax.block_until_ready(out_eval)
    x2d = x.reshape(batch, -1)
    h_ref = jnp.maximum(x2d @ w1_t + b1, 0.0)
    ref = jax.nn.log_softmax(h_ref @ w2_t + b2, axis=1)
    assert jnp.allclose(out_eval, ref, atol=7.5e-2, rtol=7.5e-2)  # bf16 matmul tolerance

    print("KERNEL_OK")
</pallas_src>

<mosaic_0001>
module attributes {stable_mosaic.version = 11 : i64} {
  func.func @_fc_kernel(%arg0: i32, %arg1: memref<1xi32, #tpu.memory_space<smem>>, %arg2: memref<2x256xf32, #tpu.memory_space<vmem>>, %arg3: memref<256x128xbf16, #tpu.memory_space<vmem>>, %arg4: memref<1x128xf32, #tpu.memory_space<vmem>>, %arg5: memref<128x128xbf16, #tpu.memory_space<vmem>>, %arg6: memref<1x128xf32, #tpu.memory_space<vmem>>, %arg7: memref<2x128xf32, #tpu.memory_space<vmem>>) attributes {dimension_semantics = [#tpu.dimension_semantics<parallel>], iteration_bounds = array<i64: 1>, scalar_prefetch = 1 : i64, scratch_operands = 0 : i64, tpu.core_type = #tpu.core_type<tc>, window_params = [{transform_indices = @transform_0, window_bounds = array<i64: 2, 256>}, {pipeline_mode = #tpu.pipeline_mode<synchronous>, transform_indices = @transform_1, window_bounds = array<i64: 256, 128>}, {pipeline_mode = #tpu.pipeline_mode<synchronous>, transform_indices = @transform_2, window_bounds = array<i64: 1, 128>}, {pipeline_mode = #tpu.pipeline_mode<synchronous>, transform_indices = @transform_3, window_bounds = array<i64: 128, 128>}, {pipeline_mode = #tpu.pipeline_mode<synchronous>, transform_indices = @transform_4, window_bounds = array<i64: 1, 128>}, {transform_indices = @transform_5, window_bounds = array<i64: 2, 128>}]} {
    %c0 = arith.constant 0 : index
    %c0_0 = arith.constant 0 : index
    %0 = vector.load %arg2[%c0, %c0_0] : memref<2x256xf32, #tpu.memory_space<vmem>>, vector<2x256xf32>
    %1 = arith.truncf %0 : vector<2x256xf32> to vector<2x256xbf16>
    %c0_1 = arith.constant 0 : index
    %c0_2 = arith.constant 0 : index
    %2 = vector.load %arg3[%c0_1, %c0_2] : memref<256x128xbf16, #tpu.memory_space<vmem>>, vector<256x128xbf16>
    %cst = arith.constant dense<0.000000e+00> : vector<2x128xf32>
    %3 = tpu.matmul %1, %2, %cst {dimension_numbers = #tpu.dot_dimension_numbers<[1], [0], [0], [1], [0, 0, 1, 1], [], []>} : vector<2x256xbf16>, vector<256x128xbf16>, vector<2x128xf32> -> vector<2x128xf32>
    %c0_3 = arith.constant 0 : index
    %c0_4 = arith.constant 0 : index
    %4 = vector.load %arg4[%c0_3, %c0_4] : memref<1x128xf32, #tpu.memory_space<vmem>>, vector<1x128xf32>
    %5 = vector.broadcast %4 : vector<1x128xf32> to vector<2x128xf32>
    %6 = arith.addf %3, %5 : vector<2x128xf32>
    %7 = tpu.iota {dimensions = array<i32: 0>} : vector<2x128xi32>
    %c2_i32 = arith.constant 2 : i32
    %8 = arith.muli %arg0, %c2_i32 : i32
    %9 = vector.broadcast %8 : i32 to vector<2x128xi32>
    %10 = arith.addi %7, %9 : vector<2x128xi32>
    %11 = tpu.iota {dimensions = array<i32: 1>} : vector<2x128xi32>
    %c-1640531535_i32 = arith.constant -1640531535 : i32
    %12 = vector.broadcast %c-1640531535_i32 : i32 to vector<2x128xi32>
    %13 = arith.muli %10, %12 : vector<2x128xi32>
    %c-2048144777_i32 = arith.constant -2048144777 : i32
    %14 = vector.broadcast %c-2048144777_i32 : i32 to vector<2x128xi32>
    %15 = arith.muli %11, %14 : vector<2x128xi32>
    %16 = arith.addi %13, %15 : vector<2x128xi32>
    %c0_5 = arith.constant 0 : index
    %17 = memref.load %arg1[%c0_5] : memref<1xi32, #tpu.memory_space<smem>>
    %c-1028477379_i32 = arith.constant -1028477379 : i32
    %18 = arith.muli %17, %c-1028477379_i32 : i32
    %19 = vector.broadcast %18 : i32 to vector<2x128xi32>
    %20 = arith.addi %16, %19 : vector<2x128xi32>
    %c16_i32 = arith.constant 16 : i32
    %21 = vector.broadcast %c16_i32 : i32 to vector<2x128xi32>
    %22 = arith.shrsi %20, %21 : vector<2x128xi32>
    %c65535_i32 = arith.constant 65535 : i32
    %23 = vector.broadcast %c65535_i32 : i32 to vector<2x128xi32>
    %24 = arith.andi %22, %23 : vector<2x128xi32>
    %25 = arith.xori %20, %24 : vector<2x128xi32>
    %c-2048144789_i32 = arith.constant -2048144789 : i32
    %26 = vector.broadcast %c-2048144789_i32 : i32 to vector<2x128xi32>
    %27 = arith.muli %25, %26 : vector<2x128xi32>
    %c13_i32 = arith.constant 13 : i32
    %28 = vector.broadcast %c13_i32 : i32 to vector<2x128xi32>
    %29 = arith.shrsi %27, %28 : vector<2x128xi32>
    %c524287_i32 = arith.constant 524287 : i32
    %30 = vector.broadcast %c524287_i32 : i32 to vector<2x128xi32>
    %31 = arith.andi %29, %30 : vector<2x128xi32>
    %32 = arith.xori %27, %31 : vector<2x128xi32>
    %c-1028477387_i32 = arith.constant -1028477387 : i32
    %33 = vector.broadcast %c-1028477387_i32 : i32 to vector<2x128xi32>
    %34 = arith.muli %32, %33 : vector<2x128xi32>
    %c16_i32_6 = arith.constant 16 : i32
    %35 = vector.broadcast %c16_i32_6 : i32 to vector<2x128xi32>
    %36 = arith.shrsi %34, %35 : vector<2x128xi32>
    %c65535_i32_7 = arith.constant 65535 : i32
    %37 = vector.broadcast %c65535_i32_7 : i32 to vector<2x128xi32>
    %38 = arith.andi %36, %37 : vector<2x128xi32>
    %39 = arith.xori %34, %38 : vector<2x128xi32>
    %c8388607_i32 = arith.constant 8388607 : i32
    %40 = vector.broadcast %c8388607_i32 : i32 to vector<2x128xi32>
    %41 = arith.andi %39, %40 : vector<2x128xi32>
    %c5033165_i32 = arith.constant 5033165 : i32
    %42 = vector.broadcast %c5033165_i32 : i32 to vector<2x128xi32>
    %43 = arith.cmpi slt, %41, %42 : vector<2x128xi32>
    %cst_8 = arith.constant 1.66666663 : f32
    %44 = vector.broadcast %cst_8 : f32 to vector<2x128xf32>
    %45 = arith.mulf %6, %44 : vector<2x128xf32>
    %cst_9 = arith.constant 0.000000e+00 : f32
    %46 = vector.broadcast %cst_9 : f32 to vector<2x128xf32>
    %47 = arith.select %43, %45, %46 : vector<2x128xi1>, vector<2x128xf32>
    %cst_10 = arith.constant 0.000000e+00 : f32
    %48 = vector.broadcast %cst_10 : f32 to vector<2x128xf32>
    %49 = arith.maximumf %47, %48 : vector<2x128xf32>
    %50 = arith.truncf %49 : vector<2x128xf32> to vector<2x128xbf16>
    %c0_11 = arith.constant 0 : index
    %c0_12 = arith.constant 0 : index
    %51 = vector.load %arg5[%c0_11, %c0_12] : memref<128x128xbf16, #tpu.memory_space<vmem>>, vector<128x128xbf16>
    %cst_13 = arith.constant dense<0.000000e+00> : vector<2x128xf32>
    %52 = tpu.matmul %50, %51, %cst_13 {dimension_numbers = #tpu.dot_dimension_numbers<[1], [0], [0], [1], [0, 0, 1, 1], [], []>} : vector<2x128xbf16>, vector<128x128xbf16>, vector<2x128xf32> -> vector<2x128xf32>
    %c0_14 = arith.constant 0 : index
    %c0_15 = arith.constant 0 : index
    %53 = vector.load %arg6[%c0_14, %c0_15] : memref<1x128xf32, #tpu.memory_space<vmem>>, vector<1x128xf32>
    %54 = vector.broadcast %53 : vector<1x128xf32> to vector<2x128xf32>
    %55 = arith.addf %52, %54 : vector<2x128xf32>
    %cst_16 = arith.constant dense<0xFF800000> : vector<2xf32>
    %56 = vector.multi_reduction <maximumf>, %55, %cst_16 [1] : vector<2x128xf32> to vector<2xf32>
    %57 = vector.shape_cast %56 : vector<2xf32> to vector<2x1xf32>
    %58 = vector.broadcast %57 : vector<2x1xf32> to vector<2x128xf32>
    %59 = arith.subf %55, %58 : vector<2x128xf32>
    %60 = math.exp %59 : vector<2x128xf32>
    %cst_17 = arith.constant dense<0.000000e+00> : vector<2xf32>
    %61 = vector.multi_reduction <add>, %60, %cst_17 [1] : vector<2x128xf32> to vector<2xf32>
    %62 = vector.shape_cast %61 : vector<2xf32> to vector<2x1xf32>
    %63 = math.log %62 : vector<2x1xf32>
    %64 = vector.broadcast %63 : vector<2x1xf32> to vector<2x128xf32>
    %65 = arith.subf %59, %64 : vector<2x128xf32>
    %c0_18 = arith.constant 0 : index
    %c0_19 = arith.constant 0 : index
    %66 = vector.load %arg7[%c0_18, %c0_19] : memref<2x128xf32, #tpu.memory_space<vmem>>, vector<2x128xf32>
    tpu.vector_store %arg7[%c0_18, %c0_19], %65 {strides = array<i32>} : memref<2x128xf32, #tpu.memory_space<vmem>>, vector<2x128xf32>,
    return
  }
  func.func @transform_0(%arg0: i32, %arg1: memref<1xi32, #tpu.memory_space<smem>>) -> (i32, i32) {
    %c0_i32 = arith.constant 0 : i32
    %c0_i32_0 = arith.constant 0 : i32
    return %arg0, %c0_i32 : i32, i32
  }
  func.func @transform_1(%arg0: i32, %arg1: memref<1xi32, #tpu.memory_space<smem>>) -> (i32, i32) {
    %c0_i32 = arith.constant 0 : i32
    %c0_i32_0 = arith.constant 0 : i32
    %c0_i32_1 = arith.constant 0 : i32
    return %c0_i32, %c0_i32_0 : i32, i32
  }
  func.func @transform_2(%arg0: i32, %arg1: memref<1xi32, #tpu.memory_space<smem>>) -> (i32, i32) {
    %c0_i32 = arith.constant 0 : i32
    %c0_i32_0 = arith.constant 0 : i32
    %c0_i32_1 = arith.constant 0 : i32
    return %c0_i32, %c0_i32_0 : i32, i32
  }
  func.func @transform_3(%arg0: i32, %arg1: memref<1xi32, #tpu.memory_space<smem>>) -> (i32, i32) {
    %c0_i32 = arith.constant 0 : i32
    %c0_i32_0 = arith.constant 0 : i32
    %c0_i32_1 = arith.constant 0 : i32
    return %c0_i32, %c0_i32_0 : i32, i32
  }
  func.func @transform_4(%arg0: i32, %arg1: memref<1xi32, #tpu.memory_space<smem>>) -> (i32, i32) {
    %c0_i32 = arith.constant 0 : i32
    %c0_i32_0 = arith.constant 0 : i32
    %c0_i32_1 = arith.constant 0 : i32
    return %c0_i32, %c0_i32_0 : i32, i32
  }
  func.func @transform_5(%arg0: i32, %arg1: memref<1xi32, #tpu.memory_space<smem>>) -> (i32, i32) {
    %c0_i32 = arith.constant 0 : i32
    %c0_i32_0 = arith.constant 0 : i32
    return %arg0, %c0_i32 : i32, i32
  }
}

</mosaic_0001>

<bundles_post_ra>
// kernel: fc_forward.1
= control target key start
LH: loop header
LB: loop body
LE: loop exit
PB: predicated region body
PF: predicated region fallthrough
CT: control target
= control target key end

     0   :  { %v519_v2 = vmov 0.0   ;;  %s653_s0 = inlined_call_operand.<no memory space> [shape: s32[1], index: 0, kind: input, shape index: {}]   ;;  %s654_s1 = inlined_call_operand.vmem [shape: f32[2,256], index: 1, kind: input, shape index: {}]   ;;  %s655_s2 = inlined_call_operand.vmem [shape: bf16[256,128], index: 2, kind: input, shape index: {}]   ;;  %s656_s3 = inlined_call_operand.vmem [shape: f32[1,128], index: 3, kind: input, shape index: {}]   ;;  %s657_s4 = inlined_call_operand.vmem [shape: bf16[128,128], index: 4, kind: input, shape index: {}]   ;;  %s658_s5 = inlined_call_operand.vmem [shape: f32[1,128], index: 5, kind: input, shape index: {}]   ;;  %s659_s6 = inlined_call_operand.hbm [shape: f32[2,128], index: 6, kind: output, shape index: {}]  }
   0x1   :  { %v467_v0 = vld [vmem:[%s655_s2 + $0x40] sm:$0xff]   ;;  %444 = vmatprep.subr.bf16.mxu1 %v519_v2  ;;  %v469_v3 = vld [vmem:[%s655_s2 + $0x48] sm:$0xff]   ;;  %v471_v5 = vld [vmem:[%s655_s2 + $0x50] sm:$0xff]  }
   0x2   :  { %v468_v1 = vld [vmem:[%s655_s2] sm:$0xff]   ;;  %413 = vmatprep.subr.bf16.mxu0 %v467_v0  ;;  %v470_v4 = vld [vmem:[%s655_s2 + $0x8] sm:$0xff]   ;;  %v472_v6 = vld [vmem:[%s655_s2 + $0x10] sm:$0xff]  }
   0x3   :  { %414 = vmatpush3.bf16.msra.mxu0 %v468_v1  ;;  %v473_v7 = vld [vmem:[%s655_s2 + $0x58] sm:$0xff]   ;;  %v475_v9 = vld [vmem:[%s655_s2 + $0x60] sm:$0xff]   ;;  %v477_v11 = vld [vmem:[%s655_s2 + $0x68] sm:$0xff]  }
   0x4   :  { %415 = vmatprep.subr.bf16.mxu0 %v469_v3  ;;  %v474_v8 = vld [vmem:[%s655_s2 + $0x18] sm:$0xff]   ;;  %v476_v10 = vld [vmem:[%s655_s2 + $0x20] sm:$0xff]   ;;  %v478_v15 = vld [vmem:[%s655_s2 + $0x28] sm:$0xff]  }
   0x5   :  { %v383_v12 = vld.sshfl [vmem:[%s654_s1] sm:$0x33 pattern:$0x76325410]  ;;  %v484_v17 = vld [vmem:[%s657_s4 + $0x8] sm:$0xff]   ;;  %v479_v18 = vld [vmem:[%s655_s2 + $0x70] sm:$0xff]  }
   0x6   :  { %v33_v13 = vcombine.high %v383_v12, %v383_v12  ;;  %v483_v14 = vld [vmem:[%s657_s4] sm:$0xff]   ;;  %v480_v19 = vld [vmem:[%s655_s2 + $0x30] sm:$0xff]  }
   0x7   :  { %416 = vmatpush3.bf16.msra.mxu0 %v470_v4  ;;  %445 = vmatpush3.bf16.msra.mxu1 %v483_v14  ;;  %v485_v20 = vld [vmem:[%s657_s4 + $0x10] sm:$0xff]  }
   0x8   :  { %417 = vmatprep.subr.bf16.mxu0 %v471_v5  ;;  %v37_v16 = vpack.c.bf16 %v33_v13, %v33_v13  ;;  %446 = vmatprep.subr.bf16.mxu1 %v519_v2 }
   0xa   :  { %205 = vmatprep.mubr.bf16.mxu0 %v37_v16 }
   0xb   :  { %418 = vmatpush3.bf16.msra.mxu0 %v472_v6  ;;  %447 = vmatpush3.bf16.msra.mxu1 %v484_v17 }
   0xc   :  { %419 = vmatprep.subr.bf16.mxu0 %v473_v7 }
   0xf   :  { %420 = vmatpush3.bf16.msra.mxu0 %v474_v8 }
  0x10   :  { %421 = vmatprep.subr.bf16.mxu0 %v475_v9 }
  0x13   :  { %422 = vmatpush3.bf16.msra.mxu0 %v476_v10 }
  0x14   :  { %423 = vmatprep.subr.bf16.mxu0 %v477_v11 }
  0x17   :  { %424 = vmatpush3.bf16.msra.mxu0 %v478_v15 }
  0x18   :  { %12 = vsyncpa [#allocation5], 0  ;;  %425 = vmatprep.subr.bf16.mxu0 %v479_v18  ;;  %v481_v21 = vld [vmem:[%s655_s2 + $0x78] sm:$0xff]   ;;  %448 = vmatprep.subr.bf16.mxu1 %v519_v2  ;;  %v36_v24 = vpack.c.bf16 %v383_v12, %v383_v12  ;;  %v487_v25 = vld [vmem:[%s657_s4 + $0x20] sm:$0xff]   ;;  %vm520_vm0 = vmmov 0   ;;  %v213_v29 = vlaneseq  ;;  %vm355_vm2 = vcmask 1041408  }
  0x19   :  { %v482_v22 = vld [vmem:[%s655_s2 + $0x38] sm:$0xff]   ;;  %449 = vmatpush3.bf16.msra.mxu1 %v485_v20  ;;  %v488_v26 = vld [vmem:[%s657_s4 + $0x28] sm:$0xff]   ;;  %v489_v27 = vld [vmem:[%s657_s4 + $0x30] sm:$0xff]   ;;  %460 = vmatprep.mubr.msk.bf16.mxu1 %vm520_vm0, %v519_v2  ;;  %s224_s23 = smul.u32 3266489917, %s653_s0 }
  0x1a   :  { %v486_v23 = vld [vmem:[%s657_s4 + $0x18] sm:$0xff]   ;;  %450 = vmatprep.subr.bf16.mxu1 %v519_v2  ;;  %v214_v30 = vshrl.u32 %v213_v29, 7  ;;  %v219_v31 = vand.u32 127, %v213_v29  ;;  %v384_v46 = vld [vmem:[%s656_s3] ss:$0 sm:$0xff]  ;;  %s521_s3 = smov [#allocation4]  }
  0x1b   :  { %426 = vmatpush3.bf16.msra.mxu0 %v480_v19  ;;  %v490_v28 = vld [vmem:[%s657_s4 + $0x38] sm:$0xff]   ;;  %v225_v35 = vstv %s224_s23  ;;  %v404_v57 = vld [vmem:[%s658_s5] ss:$0 sm:$0xff]  ;;  %s375_s5 = sshll.u32 %s521_s3, 4  ;;  %s376_s5 = int_to_ptr.vmem [resolvable:$true] %s375_s5 }
  0x1c   :  { %427 = vmatprep.subr.bf16.mxu0 %v481_v21  ;;  %v220_v32 = vmul.u32 2654435761, %v214_v30  ;;  %v221_v33 = vmul.u32 2246822519, %v219_v31  ;;  %s495_s26 = scalar_lea.vmem %s376_s5, 32  ;;  %p500_p1 = scmp.lt.s32.totalorder %s376_s5, %s376_s5 }
  0x1d   :  { %451 = vmatpush3.bf16.msra.mxu1 %v486_v23  ;;  %p496_p0 = scmp.ne.s32.totalorder %s376_s5, %s495_s26  ;;  %p501_p2 = scmp.lt.s32.totalorder %s495_s26, %s495_s26 }
  0x1e   :  { %452 = vmatprep.subr.bf16.mxu1 %v519_v2  ;;  %v222_v34 = vadd.s32 %v221_v33, %v220_v32 }
  0x1f   :  { %428 = vmatpush3.bf16.msra.mxu0 %v482_v22  ;;  %p502_p3 = por %p501_p2, %p500_p1 }
  0x20   :  { %v226_v36 = vadd.s32 %v225_v35, %v222_v34 }
  0x21   :  { %453 = vmatpush3.bf16.msra.mxu1 %v487_v25  ;;  %p503_p4 = pnand %p502_p3, %p496_p0 }
  0x22   :  { %206 = vmatmul.mubr.bf16.vlgmr.msra.gmra.mrb[0].mxu0 %v36_v24  ;;  %454 = vmatprep.subr.bf16.mxu1 %v519_v2  ;;  %v401_v37 = vshrl.u32 %v226_v36, 16 }
  0x24   :  { %v229_v38 = vxor.u32 %v401_v37, %v226_v36 }
  0x25   :  { %455 = vmatpush3.bf16.msra.mxu1 %v488_v26 }
  0x26   :  { %456 = vmatprep.subr.bf16.mxu1 %v519_v2  ;;  %v230_v39 = vmul.u32 2246822507, %v229_v38 }
  0x28   :  { %v402_v40 = vshrl.u32 %v230_v39, 13 }
  0x29   :  { %457 = vmatpush3.bf16.msra.mxu1 %v489_v27 }
  0x2a   :  { %458 = vmatprep.subr.bf16.mxu1 %v519_v2  ;;  %v233_v41 = vxor.u32 %v402_v40, %v230_v39 }
  0x2c   :  { %v234_v42 = vmul.u32 3266489909, %v233_v41 }
  0x2d   :  { %459 = vmatpush3.bf16.msra.mxu1 %v490_v28 }
  0x2e   :  { %v403_v43 = vshrl.u32 %v234_v42, 16 }
  0x30   :  { %v237_v44 = vxor.u32 %v403_v43, %v234_v42 }
  0x32   :  { %v238_v48 = vand.u32 8388607, %v237_v44 }
  0x34   :  { %vm239_vm1 = vcmp.lt.s32.totalorder %v238_v48, 5033165 }
  0xf5   :  { %v429_v45 = vpop.f32.mrb[0].mxu0 }
  0xf6   :  { %v430_v47 = vpop.f32.mrb[1].mxu0 }
  0xf7   :  { %v431_v49 = vadd.f32 %v430_v47, %v429_v45  ;;  %v432_v50 = vpop.f32.mrb[2].mxu0 }
  0xf8   :  { %v433_v51 = vpop.f32.mrb[3].mxu0 }
  0xf9   :  { %v208_v52 = vadd.f32 %v431_v49, %v384_v46 }
  0xfb   :  { %v240_v53 = vmul.f32 1.6666666, %v208_v52 }
  0xfd   :  { %v241_v54 = vsel %vm239_vm1, %v240_v53, 0.0 }
  0xfe   :  { %v242_v55 = vmax.f32 %v241_v54, 0.0 }
 0x100   :  { %v243_v56 = vpack.c.bf16 %v242_v55, %v242_v55 }
 0x102   :  { %461 = vmatmul.mubr.bf16.vlgmr.msra.gmra.mrb[0].mxu1 %v243_v56 }
 0x1d5   :  { %v349_v58 = vpop.f32.mrb[0].mxu1 }
 0x1d6   :  { %v350_v59 = vadd.f32 %v404_v57, %v349_v58  ;;  %v462_v60 = vpop.f32.mrb[1].mxu1 }
 0x1d7   :  { %v352_v61 = vpop.f32.mrb[2].mxu1 }
 0x1d8   :  { %v463_v62 = vpop.f32.mrb[3].mxu1  ;;  %v356_v63 = vsel %vm355_vm2, %v350_v59, -inf }
 0x1d9   :  { %357 = vmax.xlane.f32.xlu0 %v356_v63 }
 0x266   :  { %v358_v0 = vpop.xlane.xlu0 %357 }
 0x267   :  { %v359_v1 = vsub.f32 %v350_v59, %v358_v0 }
 0x269   :  { %v360_v2 = vmul.f32 1.442695, %v359_v1 }
 0x26b   :  { %491 = vpow2.f32 %v360_v2 }
 0x275   :  { %v492_v3 = vpop.eup %491 }
 0x276   :  { %v362_v4 = vsel %vm355_vm2, %v492_v3, 0.0 }
 0x277   :  { %363 = vadd.xlane.f32.xlu0 %v362_v4 }
 0x304   :  { %v364_v5 = vpop.xlane.xlu0 %363 }
 0x305   :  { %493 = vlog2.f32 %v364_v5 }
 0x30f   :  { %v494_v6 = vpop.eup %493 }
 0x310   :  { %v366_v7 = vmul.f32 0.6931472, %v494_v6 }
 0x312   :  { %v367_v8 = vsub.f32 %v359_v1, %v366_v7 }
 0x314   :  { %368 = vst [vmem:[#allocation4] sm:$0x3] %v367_v8 }
 0x315   :  { %506 = shalt.err (!%p503_p4)
}
 0x316   :  { %s507_s1 = scalar_lea.hbm %s659_s6, 32 }
 0x317   :  { %p508_p5 = scmp.ne.s32.totalorder %s659_s6, %s507_s1  ;;  %p511_p6 = scmp.lt.u32.totalorder %s507_s1, %s659_s6 }
 0x319   :  { %p513_p7 = pnand %p511_p6, %p508_p5 }
 0x31b   :  { %516 = shalt.err (!%p513_p7)
}
 0x31c   :  { %378 = dma.vmem_to_hbm [thread:$0]  %s376_s5, 32, %s659_s6, [#allocation5]  }
 0x31d   :  { %517 = dma.done.wait [#allocation5], 32  }
 0x31e   :  { %518 = vsyncadd [#allocation5], 4294967264 }
 0x31f   :  { %382 = vsyncpa [#allocation5], 1 }

</bundles_post_ra>
